<compile_context>
chip_gen: v7x
topology: tpu7x:2x2x1
jax: 0.10.0
libtpu: 0.0.40
codegen_flags: <defaults>
</compile_context>

<pallas_src>
import math
import functools

import jax
import jax.numpy as jnp
from jax.experimental import pallas as pl
from jax.experimental.pallas import tpu as pltpu


# ----------------------------- Pallas kernel ------------------------------- #

def _mha_fused_kernel(qkv_ref, wproj_ref, wo_ref, bo_ref, o_ref):
    """Fused MHA, one invocation for the whole batch.

    qkv_ref  : (3, H*B*S, D) bf16 -- stacked q/k/v inputs, rows ordered (h, b, s)
    wproj_ref: (3, D, D)     bf16 -- pre-transposed per-head weights (q weight pre-scaled)
    wo_ref   : (H, D, E)     bf16 -- output Linear weight W_o.T reshaped head-major
    bo_ref   : (1, E)        f32  -- output Linear bias
    o_ref    : (B, S, E)     f32  -- output
    """
    B, S, E = o_ref.shape
    H, D, _ = wo_ref.shape
    HB = H * B

    # q/k/v projections: one batched matmul over {q, k, v}; bf16 operands, f32 accumulation.
    x3 = qkv_ref[...]                                       # (3, H*B*S, D) bf16
    y3 = jnp.einsum("gnd,gde->gne", x3, wproj_ref[...],
                    preferred_element_type=jnp.float32)     # (3, H*B*S, D) f32

    q = y3[0].reshape(HB, S, D).astype(jnp.bfloat16)
    k = y3[1].reshape(HB, S, D).astype(jnp.bfloat16)
    v = y3[2].reshape(HB, S, D).astype(jnp.bfloat16)

    # Head-batched scaled-dot-product attention; 1/sqrt(D) already folded into the q weight.
    s = jnp.einsum("nqd,nkd->nqk", q, k,
                   preferred_element_type=jnp.float32)      # (H*B, S, S) f32

    # Numerically-stable softmax over the last dim, f32; reciprocal on the (idle) EUP.
    m = jnp.max(s, axis=-1, keepdims=True)
    e = jnp.exp(s - m)
    denom = jnp.sum(e, axis=-1, keepdims=True)
    p = e * pl.reciprocal(denom, approx=True)

    ctx = jnp.einsum("nqk,nkd->nqd", p.astype(jnp.bfloat16), v,
                     preferred_element_type=jnp.float32)    # (H*B, S, D) f32

    # Fused head-concat + output Linear: accumulate ctx_h @ Wo^T[h*D:(h+1)*D, :] per head
    # (no lane concat, no transpose); H tiny extra MXU ops are absorbed by the idle MXU.
    ctx3 = ctx.reshape(H, B * S, D)                         # rows ordered (b, s)
    acc = None
    for h in range(H):                                      # H is small & static -> unrolled
        ctx_h = ctx3[h].astype(jnp.bfloat16)                # (B*S, D)
        part = jnp.dot(ctx_h, wo_ref[h],
                       preferred_element_type=jnp.float32)  # (B*S, E) f32
        acc = part if acc is None else acc + part

    y = acc + bo_ref[...]
    # NOTE: at the toy E=32 the store is lane-masked; at production E >= 128 this (B, S, E)
    # layout is already lane-dense (the right choice per the perf review).
    o_ref[...] = y.reshape(B, S, E).astype(o_ref.dtype)


# ------------------------------ Host wrapper -------------------------------- #

def multi_head_attention(key, query, value, params, n_heads):
    """key/query/value: (B, S, E) float32. Returns (B, S, E) float32."""
    B, S, E = key.shape
    H = n_heads
    D = E // H
    scale = 1.0 / math.sqrt(D)

    # Head-major relayout (h, b, s, d) done once on the host (plain XLA, outside the kernel)
    # so the kernel never transposes; cast to bf16 here to halve input DMA bytes.
    def to_heads(x):
        return x.reshape(B, S, H, D).transpose(2, 0, 1, 3).reshape(H * B * S, D)

    qkv = jnp.stack([to_heads(query), to_heads(key), to_heads(value)])
    qkv = qkv.astype(jnp.bfloat16)                               # (3, H*B*S, D)

    # Pre-transposed per-head projection weights (y = x @ W.T); fold 1/sqrt(D) into q weight.
    wproj = jnp.stack([params["wq"].T * scale, params["wk"].T, params["wv"].T])
    wproj = wproj.astype(jnp.bfloat16)                           # (3, D, D)

    # Output Linear weight: W_o.T reshaped into per-head (D, E) slabs; bias kept f32.
    wo_hde = params["wo"].T.reshape(H, D, E).astype(jnp.bfloat16)  # (H, D, E)
    bo2d = params["bo"].reshape(1, E).astype(jnp.float32)          # (1, E)

    vmem = pl.BlockSpec(memory_space=pltpu.MemorySpace.VMEM)

    out = pl.pallas_call(
        _mha_fused_kernel,
        out_shape=jax.ShapeDtypeStruct((B, S, E), jnp.float32),
        in_specs=[vmem, vmem, vmem, vmem],
        out_specs=vmem,
    )(qkv, wproj, wo_hde, bo2d)
    return out


# --------------------------- Pure-JAX reference ----------------------------- #

def multi_head_attention_ref(key, query, value, params, n_heads):
    B, S, E = key.shape
    H = n_heads
    D = E // H

    def split_heads(x):
        return x.reshape(B, S, H, D)

    q = split_heads(query) @ params["wq"].T
    k = split_heads(key) @ params["wk"].T
    v = split_heads(value) @ params["wv"].T
    q = jnp.transpose(q, (0, 2, 1, 3))
    k = jnp.transpose(k, (0, 2, 1, 3))
    v = jnp.transpose(v, (0, 2, 1, 3))

    scores = jnp.einsum("bhqd,bhkd->bhqk", q, k) / math.sqrt(D)
    p = jax.nn.softmax(scores, axis=-1)
    o = jnp.einsum("bhqk,bhkd->bhqd", p, v)
    concat = jnp.transpose(o, (0, 2, 1, 3)).reshape(B, S, E)
    return concat @ params["wo"].T + params["bo"]


# ---------------------------------- Main ------------------------------------ #

if __name__ == "__main__":
    # Small, module-consistent shapes.
    B, S, E, H = 2, 8, 32, 4          # batch, seq, embed_dim, n_heads
    D = E // H                        # single_head_dim

    root = jax.random.PRNGKey(0)
    k_in, k_q, k_v, k_wq, k_wk, k_wv, k_wo, k_bo = jax.random.split(root, 8)

    key_x = jax.random.normal(k_in, (B, S, E), dtype=jnp.float32)
    query_x = jax.random.normal(k_q, (B, S, E), dtype=jnp.float32)
    value_x = jax.random.normal(k_v, (B, S, E), dtype=jnp.float32)

    # Deterministic parameter init (nn.Linear-like uniform fan-in scaling).
    lim_d = 1.0 / math.sqrt(D)
    lim_e = 1.0 / math.sqrt(E)
    params = {
        "wq": jax.random.uniform(k_wq, (D, D), jnp.float32, -lim_d, lim_d),
        "wk": jax.random.uniform(k_wk, (D, D), jnp.float32, -lim_d, lim_d),
        "wv": jax.random.uniform(k_wv, (D, D), jnp.float32, -lim_d, lim_d),
        "wo": jax.random.uniform(k_wo, (E, E), jnp.float32, -lim_e, lim_e),
        "bo": jax.random.uniform(k_bo, (E,), jnp.float32, -lim_e, lim_e),
    }

    fn = jax.jit(functools.partial(multi_head_attention, n_heads=H))
    out = fn(key_x, query_x, value_x, params)
    out = jax.block_until_ready(out)

    ref = multi_head_attention_ref(key_x, query_x, value_x, params, H)
    assert out.shape == (B, S, E)
    # Tolerance reflects two deliberate deviations from the f32 reference:
    # bf16 MXU operands (f32 accumulation) and the approx EUP reciprocal in the softmax.
    assert jnp.allclose(out, ref, rtol=2e-2, atol=2e-2), "mismatch vs reference"

    print("KERNEL_OK")
</pallas_src>

<mosaic_0001>
module attributes {stable_mosaic.version = 11 : i64} {
  func.func @_mha_fused_kernel(%arg0: memref<3x64x8xbf16, #tpu.memory_space<vmem>>, %arg1: memref<3x8x8xbf16, #tpu.memory_space<vmem>>, %arg2: memref<4x8x32xbf16, #tpu.memory_space<vmem>>, %arg3: memref<1x32xf32, #tpu.memory_space<vmem>>, %arg4: memref<2x8x32xf32, #tpu.memory_space<vmem>>) attributes {dimension_semantics = [], scalar_prefetch = 0 : i64, scratch_operands = 0 : i64, tpu.core_type = #tpu.core_type<tc>} {
    %c0 = arith.constant 0 : index
    %c0_0 = arith.constant 0 : index
    %c0_1 = arith.constant 0 : index
    %0 = vector.load %arg0[%c0, %c0_0, %c0_1] : memref<3x64x8xbf16, #tpu.memory_space<vmem>>, vector<3x64x8xbf16>
    %c0_2 = arith.constant 0 : index
    %c0_3 = arith.constant 0 : index
    %c0_4 = arith.constant 0 : index
    %1 = vector.load %arg1[%c0_2, %c0_3, %c0_4] : memref<3x8x8xbf16, #tpu.memory_space<vmem>>, vector<3x8x8xbf16>
    "tpu.trace_start"() <{level = 10 : i32, message = "gnd,gde->gne"}> : () -> ()
    %cst = arith.constant dense<0.000000e+00> : vector<3x64x8xf32>
    %2 = tpu.matmul %0, %1, %cst {dimension_numbers = #tpu.dot_dimension_numbers<[2], [1], [1], [2], [0, 0, 0, 1, 1, 2], [0], [0]>} : vector<3x64x8xbf16>, vector<3x8x8xbf16>, vector<3x64x8xf32> -> vector<3x64x8xf32>
    "tpu.trace_stop"() : () -> ()
    %3 = vector.extract_strided_slice %2 {offsets = [0, 0, 0], sizes = [1, 64, 8], strides = [1, 1, 1]} : vector<3x64x8xf32> to vector<1x64x8xf32>
    %4 = vector.shape_cast %3 : vector<1x64x8xf32> to vector<64x8xf32>
    %5 = vector.shape_cast %4 : vector<64x8xf32> to vector<8x8x8xf32>
    %6 = arith.truncf %5 : vector<8x8x8xf32> to vector<8x8x8xbf16>
    %7 = vector.extract_strided_slice %2 {offsets = [1, 0, 0], sizes = [1, 64, 8], strides = [1, 1, 1]} : vector<3x64x8xf32> to vector<1x64x8xf32>
    %8 = vector.shape_cast %7 : vector<1x64x8xf32> to vector<64x8xf32>
    %9 = vector.shape_cast %8 : vector<64x8xf32> to vector<8x8x8xf32>
    %10 = arith.truncf %9 : vector<8x8x8xf32> to vector<8x8x8xbf16>
    %11 = vector.extract_strided_slice %2 {offsets = [2, 0, 0], sizes = [1, 64, 8], strides = [1, 1, 1]} : vector<3x64x8xf32> to vector<1x64x8xf32>
    %12 = vector.shape_cast %11 : vector<1x64x8xf32> to vector<64x8xf32>
    %13 = vector.shape_cast %12 : vector<64x8xf32> to vector<8x8x8xf32>
    %14 = arith.truncf %13 : vector<8x8x8xf32> to vector<8x8x8xbf16>
    "tpu.trace_start"() <{level = 10 : i32, message = "nqd,nkd->nqk"}> : () -> ()
    %cst_5 = arith.constant dense<0.000000e+00> : vector<8x8x8xf32>
    %15 = tpu.matmul %6, %10, %cst_5 {dimension_numbers = #tpu.dot_dimension_numbers<[2], [2], [1], [1], [0, 0, 0, 1, 1, 1], [0], [0]>} : vector<8x8x8xbf16>, vector<8x8x8xbf16>, vector<8x8x8xf32> -> vector<8x8x8xf32>
    "tpu.trace_stop"() : () -> ()
    %cst_6 = arith.constant dense<0xFF800000> : vector<8x8xf32>
    %16 = vector.multi_reduction <maximumf>, %15, %cst_6 [2] : vector<8x8x8xf32> to vector<8x8xf32>
    %17 = vector.shape_cast %16 : vector<8x8xf32> to vector<8x8x1xf32>
    %18 = vector.broadcast %17 : vector<8x8x1xf32> to vector<8x8x8xf32>
    %19 = arith.subf %15, %18 : vector<8x8x8xf32>
    %20 = math.exp %19 : vector<8x8x8xf32>
    %cst_7 = arith.constant dense<0.000000e+00> : vector<8x8xf32>
    %21 = vector.multi_reduction <add>, %20, %cst_7 [2] : vector<8x8x8xf32> to vector<8x8xf32>
    %22 = vector.shape_cast %21 : vector<8x8xf32> to vector<8x8x1xf32>
    %23 = tpu.reciprocal %22 {approx = true} : vector<8x8x1xf32> -> vector<8x8x1xf32>
    %24 = vector.broadcast %23 : vector<8x8x1xf32> to vector<8x8x8xf32>
    %25 = arith.mulf %20, %24 : vector<8x8x8xf32>
    %26 = arith.truncf %25 : vector<8x8x8xf32> to vector<8x8x8xbf16>
    "tpu.trace_start"() <{level = 10 : i32, message = "nqk,nkd->nqd"}> : () -> ()
    %cst_8 = arith.constant dense<0.000000e+00> : vector<8x8x8xf32>
    %27 = tpu.matmul %26, %14, %cst_8 {dimension_numbers = #tpu.dot_dimension_numbers<[2], [1], [1], [2], [0, 0, 0, 1, 1, 2], [0], [0]>} : vector<8x8x8xbf16>, vector<8x8x8xbf16>, vector<8x8x8xf32> -> vector<8x8x8xf32>
    "tpu.trace_stop"() : () -> ()
    %28 = vector.shape_cast %27 : vector<8x8x8xf32> to vector<4x16x8xf32>
    %29 = vector.extract_strided_slice %28 {offsets = [0, 0, 0], sizes = [1, 16, 8], strides = [1, 1, 1]} : vector<4x16x8xf32> to vector<1x16x8xf32>
    %30 = vector.shape_cast %29 : vector<1x16x8xf32> to vector<16x8xf32>
    %31 = arith.truncf %30 : vector<16x8xf32> to vector<16x8xbf16>
    %c0_9 = arith.constant 0 : index
    %c0_10 = arith.constant 0 : index
    %c0_11 = arith.constant 0 : index
    %32 = vector.load %arg2[%c0_9, %c0_10, %c0_11] : memref<4x8x32xbf16, #tpu.memory_space<vmem>>, vector<1x8x32xbf16>
    %33 = vector.shape_cast %32 : vector<1x8x32xbf16> to vector<8x32xbf16>
    %cst_12 = arith.constant dense<0.000000e+00> : vector<16x32xf32>
    %34 = tpu.matmul %31, %33, %cst_12 {dimension_numbers = #tpu.dot_dimension_numbers<[1], [0], [0], [1], [0, 0, 1, 1], [], []>} : vector<16x8xbf16>, vector<8x32xbf16>, vector<16x32xf32> -> vector<16x32xf32>
    %35 = vector.extract_strided_slice %28 {offsets = [1, 0, 0], sizes = [1, 16, 8], strides = [1, 1, 1]} : vector<4x16x8xf32> to vector<1x16x8xf32>
    %36 = vector.shape_cast %35 : vector<1x16x8xf32> to vector<16x8xf32>
    %37 = arith.truncf %36 : vector<16x8xf32> to vector<16x8xbf16>
    %c1 = arith.constant 1 : index
    %c0_13 = arith.constant 0 : index
    %c0_14 = arith.constant 0 : index
    %38 = vector.load %arg2[%c1, %c0_13, %c0_14] : memref<4x8x32xbf16, #tpu.memory_space<vmem>>, vector<1x8x32xbf16>
    %39 = vector.shape_cast %38 : vector<1x8x32xbf16> to vector<8x32xbf16>
    %cst_15 = arith.constant dense<0.000000e+00> : vector<16x32xf32>
    %40 = tpu.matmul %37, %39, %cst_15 {dimension_numbers = #tpu.dot_dimension_numbers<[1], [0], [0], [1], [0, 0, 1, 1], [], []>} : vector<16x8xbf16>, vector<8x32xbf16>, vector<16x32xf32> -> vector<16x32xf32>
    %41 = arith.addf %34, %40 : vector<16x32xf32>
    %42 = vector.extract_strided_slice %28 {offsets = [2, 0, 0], sizes = [1, 16, 8], strides = [1, 1, 1]} : vector<4x16x8xf32> to vector<1x16x8xf32>
    %43 = vector.shape_cast %42 : vector<1x16x8xf32> to vector<16x8xf32>
    %44 = arith.truncf %43 : vector<16x8xf32> to vector<16x8xbf16>
    %c2 = arith.constant 2 : index
    %c0_16 = arith.constant 0 : index
    %c0_17 = arith.constant 0 : index
    %45 = vector.load %arg2[%c2, %c0_16, %c0_17] : memref<4x8x32xbf16, #tpu.memory_space<vmem>>, vector<1x8x32xbf16>
    %46 = vector.shape_cast %45 : vector<1x8x32xbf16> to vector<8x32xbf16>
    %cst_18 = arith.constant dense<0.000000e+00> : vector<16x32xf32>
    %47 = tpu.matmul %44, %46, %cst_18 {dimension_numbers = #tpu.dot_dimension_numbers<[1], [0], [0], [1], [0, 0, 1, 1], [], []>} : vector<16x8xbf16>, vector<8x32xbf16>, vector<16x32xf32> -> vector<16x32xf32>
    %48 = arith.addf %41, %47 : vector<16x32xf32>
    %49 = vector.extract_strided_slice %28 {offsets = [3, 0, 0], sizes = [1, 16, 8], strides = [1, 1, 1]} : vector<4x16x8xf32> to vector<1x16x8xf32>
    %50 = vector.shape_cast %49 : vector<1x16x8xf32> to vector<16x8xf32>
    %51 = arith.truncf %50 : vector<16x8xf32> to vector<16x8xbf16>
    %c3 = arith.constant 3 : index
    %c0_19 = arith.constant 0 : index
    %c0_20 = arith.constant 0 : index
    %52 = vector.load %arg2[%c3, %c0_19, %c0_20] : memref<4x8x32xbf16, #tpu.memory_space<vmem>>, vector<1x8x32xbf16>
    %53 = vector.shape_cast %52 : vector<1x8x32xbf16> to vector<8x32xbf16>
    %cst_21 = arith.constant dense<0.000000e+00> : vector<16x32xf32>
    %54 = tpu.matmul %51, %53, %cst_21 {dimension_numbers = #tpu.dot_dimension_numbers<[1], [0], [0], [1], [0, 0, 1, 1], [], []>} : vector<16x8xbf16>, vector<8x32xbf16>, vector<16x32xf32> -> vector<16x32xf32>
    %55 = arith.addf %48, %54 : vector<16x32xf32>
    %c0_22 = arith.constant 0 : index
    %c0_23 = arith.constant 0 : index
    %56 = vector.load %arg3[%c0_22, %c0_23] : memref<1x32xf32, #tpu.memory_space<vmem>>, vector<1x32xf32>
    %57 = vector.broadcast %56 : vector<1x32xf32> to vector<16x32xf32>
    %58 = arith.addf %55, %57 : vector<16x32xf32>
    %59 = vector.shape_cast %58 : vector<16x32xf32> to vector<2x8x32xf32>
    %c0_24 = arith.constant 0 : index
    %c0_25 = arith.constant 0 : index
    %c0_26 = arith.constant 0 : index
    %60 = vector.load %arg4[%c0_24, %c0_25, %c0_26] : memref<2x8x32xf32, #tpu.memory_space<vmem>>, vector<2x8x32xf32>
    tpu.vector_store %arg4[%c0_24, %c0_25, %c0_26], %59 {strides = array<i32>} : memref<2x8x32xf32, #tpu.memory_space<vmem>>, vector<2x8x32xf32>,
    return
  }
}

</mosaic_0001>

<bundles_post_ra>
// kernel: multi_head_attention.1
= control target key start
LH: loop header
LB: loop body
LE: loop exit
PB: predicated region body
PF: predicated region fallthrough
CT: control target
= control target key end

     0   :  { %vm79_vm0 = vcmask 1043456   ;;  %vm66_vm1 = vcmask 64512   ;;  %s2036_s0 = inlined_call_operand.vmem [shape: bf16[3,64,8], index: 0, kind: input, shape index: {}]   ;;  %s2037_s1 = inlined_call_operand.vmem [shape: bf16[3,8,8], index: 1, kind: input, shape index: {}]   ;;  %s2038_s2 = inlined_call_operand.vmem [shape: bf16[4,8,32], index: 2, kind: input, shape index: {}]   ;;  %s2039_s3 = inlined_call_operand.vmem [shape: f32[1,32], index: 3, kind: input, shape index: {}]   ;;  %s2040_s4 = inlined_call_operand.hbm [shape: f32[2,8,32], index: 4, kind: output, shape index: {}]  }
   0x1   :  { %v44_v0 = vld [vmem:[%s2037_s1 + $0x4] sm:$0xf]  ;;  %v1697_v3 = vld [vmem:[%s2036_s0 + $0x28] sm:$0xff]   ;;  %v43_v4 = vld [vmem:[%s2037_s1] sm:$0xf] }
   0x2   :  { %1689 = vmatprep.subr.msk.bf16.mxu1 %vm79_vm0, %v44_v0  ;;  %v181_v1 = vsel %vm79_vm0, %v44_v0, 0  ;;  %v1696_v2 = vld [vmem:[%s2036_s0 + $0x20] sm:$0xff]   ;;  %1688 = vmatprep.subr.msk.bf16.mxu0 %vm79_vm0, %v43_v4  ;;  %v81_v5 = vsel %vm79_vm0, %v43_v4, 0  ;;  %v1699_v7 = vld [vmem:[%s2036_s0 + $0x30] sm:$0xff]   ;;  %v1700_v8 = vld [vmem:[%s2036_s0 + $0x8] sm:$0xff]  }
   0x3   :  { %1549 = vmatpush3.bf16.msra.mxu1 %v181_v1  ;;  %1550 = vmatprep.mubr.msk.bf16.mxu1 %vm66_vm1, %v1696_v2  ;;  %v1698_v6 = vld [vmem:[%s2036_s0] sm:$0xff]   ;;  %v1702_v9 = vld [vmem:[%s2036_s0 + $0x10] sm:$0xff]   ;;  %v1701_v10 = vld [vmem:[%s2036_s0 + $0x38] sm:$0xff]  }
   0x4   :  { %1539 = vmatpush3.bf16.msra.mxu0 %v81_v5  ;;  %1540 = vmatprep.mubr.msk.bf16.mxu0 %vm66_vm1, %v1698_v6  ;;  %v45_v11 = vld [vmem:[%s2037_s1 + $0x8] sm:$0xf]  ;;  %v1703_v12 = vld [vmem:[%s2036_s0 + $0x18] sm:$0xff]   ;;  %v1704_v14 = vld [vmem:[%s2036_s0 + $0x40] sm:$0xff]  }
   0x5   :  { %1690 = vmatprep.subr.msk.bf16.mxu0 %vm79_vm0, %v45_v11  ;;  %v281_v13 = vsel %vm79_vm0, %v45_v11, 0 }
   0x6   :  { %1551 = vmatmul.mubr.msk.bf16.vlgmr.msra.gmra.mrb[0].mxu1 %vm66_vm1, %v1697_v3 }
   0x7   :  { %1554 = vmatprep.mubr.msk.bf16.mxu1 %vm66_vm1, %v1699_v7  ;;  %1541 = vmatmul.mubr.msk.bf16.vlgmr.msra.gmra.mrb[0].mxu0 %vm66_vm1, %v1700_v8 }
   0x8   :  { %1544 = vmatprep.mubr.msk.bf16.mxu0 %vm66_vm1, %v1702_v9  ;;  %1559 = vmatpush3.bf16.msra.mxu0 %v281_v13 }
   0x9   :  { %9 = vsyncpa [#allocation3], 0  ;;  %v1705_v15 = vld [vmem:[%s2036_s0 + $0x48] sm:$0xff]   ;;  %v1706_v16 = vld [vmem:[%s2036_s0 + $0x50] sm:$0xff]   ;;  %v1764_v18 = vmov 0.0   ;;  %vm1765_vm2 = vmmov 0  }
   0xa   :  { %v1707_v17 = vld [vmem:[%s2036_s0 + $0x58] sm:$0xff]   ;;  %1580 = vmatprep.subr.bf16.mxu0 %v1764_v18  ;;  %1568 = vmatprep.subr.bf16.mxu1 %v1764_v18  ;;  %vm1416_vm3 = vcmask 261120   ;;  %s1766_s26 = smov [#allocation2]  }
   0xb   :  { %s1424_s27 = sshll.u32 %s1766_s26, 4  ;;  %s1425_s27 = int_to_ptr.vmem [resolvable:$true] %s1424_s27 }
   0xc   :  { %s1740_s28 = scalar_lea.vmem %s1425_s27, 256  ;;  %p1745_p1 = scmp.lt.s32.totalorder %s1425_s27, %s1425_s27 }
   0xd   :  { %p1741_p0 = scmp.ne.s32.totalorder %s1425_s27, %s1740_s28  ;;  %p1746_p2 = scmp.lt.s32.totalorder %s1740_s28, %s1740_s28 }
   0xe   :  { %1555 = vmatmul.mubr.msk.bf16.gmra.mrb[4].mxu1 %vm66_vm1, %v1701_v10 }
   0xf   :  { %1545 = vmatmul.mubr.msk.bf16.gmra.mrb[4].mxu0 %vm66_vm1, %v1703_v12  ;;  %1570 = vmatprep.mubr.msk.bf16.mxu1 %vm1765_vm2, %v1764_v18  ;;  %p1747_p3 = por %p1746_p2, %p1745_p1 }
  0x10   :  { %1560 = vmatprep.mubr.msk.bf16.mxu0 %vm66_vm1, %v1704_v14 }
  0x11   :  { %p1748_p4 = pnand %p1747_p3, %p1741_p0 }
  0x17   :  { %1561 = vmatmul.mubr.msk.bf16.vlgmr.msra.gmra.mrb[8].mxu0 %vm66_vm1, %v1705_v15 }
  0x18   :  { %1564 = vmatprep.mubr.msk.bf16.mxu0 %vm66_vm1, %v1706_v16 }
  0x1f   :  { %1565 = vmatmul.mubr.msk.bf16.gmra.mrb[12].mxu0 %vm66_vm1, %v1707_v17 }
  0x20   :  { %1582 = vmatprep.mubr.msk.bf16.mxu0 %vm1765_vm2, %v1764_v18 }
  0xd9   :  { %v1552_v19 = vpop.f32.mrb[0].mxu1 }
  0xda   :  { %v358_v20 = vpack.c.bf16 %v1552_v19, %v1552_v19  ;;  %v217_v21 = vpop.f32.mrb[1].mxu1  ;;  %v1542_v24 = vpop.f32.mrb[0].mxu0 }
  0xdb   :  { %v356_v22 = vpack.c.bf16 %v217_v21, %v217_v21  ;;  %v1553_v23 = vpop.f32.mrb[2].mxu1  ;;  %v117_v27 = vpop.f32.mrb[1].mxu0  ;;  %v350_v31 = vpack.c.bf16 %v1542_v24, %v1542_v24 }
  0xdc   :  { %v468_v25 = vsel %vm66_vm1, %v358_v20, 0  ;;  %v220_v26 = vpop.f32.mrb[3].mxu1  ;;  %v1543_v29 = vpop.f32.mrb[2].mxu0  ;;  %v348_v34 = vpack.c.bf16 %v117_v27, %v117_v27  ;;  %v359_v46 = vpack.c.bf16 %v1553_v23, %v1553_v23 }
  0xdd   :  { %v376_v28 = vsel %vm66_vm1, %v356_v22, 0  ;;  %1581 = vmatpush3.bf16.xpose.msra.mxu0 %v468_v25  ;;  %v120_v30 = vpop.f32.mrb[3].mxu0  ;;  %v357_v32 = vpack.c.bf16 %v220_v26, %v220_v26  ;;  %v351_v58 = vpack.c.bf16 %v1543_v29, %v1543_v29 }
  0xde   :  { %1569 = vmatpush3.bf16.xpose.msra.mxu1 %v376_v28  ;;  %1592 = vmatprep.subr.bf16.mxu0 %v1764_v18  ;;  %v349_v49 = vpack.c.bf16 %v120_v30, %v120_v30  ;;  %v514_v52 = vsel %vm66_vm1, %v359_v46, 0 }
  0xdf   :  { %1574 = vmatprep.subr.bf16.mxu1 %v1764_v18  ;;  %v422_v41 = vsel %vm66_vm1, %v357_v32, 0 }
  0xe1   :  { %v1556_v33 = vpop.f32.mrb[4].mxu1 }
  0xe2   :  { %v233_v35 = vpop.f32.mrb[5].mxu1  ;;  %v1546_v37 = vpop.f32.mrb[4].mxu0  ;;  %v362_v45 = vpack.c.bf16 %v1556_v33, %v1556_v33 }
  0xe3   :  { %v360_v36 = vpack.c.bf16 %v233_v35, %v233_v35  ;;  %v1557_v38 = vpop.f32.mrb[6].mxu1  ;;  %v133_v39 = vpop.f32.mrb[5].mxu0  ;;  %v354_v56 = vpack.c.bf16 %v1546_v37, %v1546_v37 }
  0xe4   :  { %1583 = vmatmul.mubr.msk.bf16.vlgmr.msra.gmra.mrb[16].mxu0 %vm66_vm1, %v350_v31  ;;  %v236_v40 = vpop.f32.mrb[7].mxu1  ;;  %v1547_v43 = vpop.f32.mrb[6].mxu0  ;;  %v352_v47 = vpack.c.bf16 %v133_v39, %v133_v39  ;;  %v652_v48 = vsel %vm66_vm1, %v362_v45, 0  ;;  %v363_v61 = vpack.c.bf16 %v1557_v38, %v1557_v38 }
  0xe5   :  { %v560_v42 = vsel %vm66_vm1, %v360_v36, 0  ;;  %1571 = vmatmul.mubr.msk.bf16.vlgmr.msra.gmra.mrb[8].mxu1 %vm66_vm1, %v348_v34  ;;  %1594 = vmatprep.mubr.msk.bf16.mxu0 %vm1765_vm2, %v1764_v18  ;;  %v136_v44 = vpop.f32.mrb[7].mxu0  ;;  %v361_v57 = vpack.c.bf16 %v236_v40, %v236_v40  ;;  %v355_v1 = vpack.c.bf16 %v1547_v43, %v1547_v43 }
  0xe6   :  { %1575 = vmatpush3.bf16.xpose.msra.mxu1 %v422_v41  ;;  %1593 = vmatpush3.bf16.xpose.msra.mxu0 %v560_v42  ;;  %v353_v62 = vpack.c.bf16 %v136_v44, %v136_v44  ;;  %v698_v63 = vsel %vm66_vm1, %v363_v61, 0 }
  0xe7   :  { %1576 = vmatprep.mubr.msk.bf16.mxu1 %vm1765_vm2, %v1764_v18  ;;  %1586 = vmatprep.subr.bf16.mxu1 %v1764_v18  ;;  %v606_v60 = vsel %vm66_vm1, %v361_v57, 0 }
  0xe8   :  { %1604 = vmatprep.subr.bf16.mxu0 %v1764_v18 }
  0xea   :  { %v1878_v50 = vpop.f32.mrb[8].mxu0 }
  0xeb   :  { %v317_v51 = vpop.f32.mrb[9].mxu0 }
  0xec   :  { %v1883_v53 = vpop.f32.mrb[10].mxu0  ;;  %v364_v55 = vpack.c.bf16 %v317_v51, %v317_v51 }
  0xed   :  { %1577 = vmatmul.mubr.msk.bf16.vlgmr.msra.gmra.mrb[12].mxu1 %vm66_vm1, %v349_v49  ;;  %1595 = vmatmul.mubr.msk.bf16.vlgmr.msra.gmra.mrb[20].mxu0 %vm66_vm1, %v352_v47  ;;  %v320_v54 = vpop.f32.mrb[11].mxu0 }
  0xee   :  { %1587 = vmatpush3.bf16.xpose.msra.mxu1 %v514_v52  ;;  %1605 = vmatpush3.bf16.xpose.msra.mxu0 %v652_v48  ;;  %v840_v59 = vsel %vm79_vm0, %v364_v55, 0  ;;  %v365_v0 = vpack.c.bf16 %v320_v54, %v320_v54 }
  0xef   :  { %1588 = vmatprep.mubr.msk.bf16.mxu1 %vm1765_vm2, %v1764_v18  ;;  %1606 = vmatprep.mubr.msk.bf16.mxu0 %vm1765_vm2, %v1764_v18 }
  0xf0   :  { %1598 = vmatprep.subr.bf16.mxu1 %v1764_v18  ;;  %1616 = vmatprep.subr.bf16.mxu0 %v1764_v18  ;;  %v886_v2 = vsel %vm79_vm0, %v365_v0, 0 }
  0xf2   :  { %v1911_v3 = vpop.f32.mrb[12].mxu0 }
  0xf3   :  { %v1913_v4 = vpop.f32.mrb[13].mxu0 }
  0xf4   :  { %v1915_v5 = vpop.f32.mrb[14].mxu0 }
  0xf5   :  { %1589 = vmatmul.mubr.msk.bf16.vlgmr.msra.gmra.mrb[16].mxu1 %vm66_vm1, %v351_v58  ;;  %1607 = vmatmul.mubr.msk.bf16.vlgmr.msra.gmra.mrb[24].mxu0 %vm66_vm1, %v354_v56  ;;  %v1917_v6 = vpop.f32.mrb[15].mxu0 }
  0xf6   :  { %1599 = vmatpush3.bf16.xpose.msra.mxu1 %v606_v60  ;;  %1600 = vmatprep.mubr.msk.bf16.mxu1 %vm1765_vm2, %v1764_v18 }
  0xf7   :  { %1610 = vmatprep.subr.bf16.mxu1 %v1764_v18  ;;  %1617 = vmatpush3.bf16.msra.mxu0 %v840_v59 }
  0xf8   :  { %1618 = vmatprep.mubr.msk.bf16.mxu0 %vm1765_vm2, %v1764_v18  ;;  %1628 = vmatprep.subr.bf16.mxu0 %v1764_v18 }
  0xfd   :  { %1601 = vmatmul.mubr.msk.bf16.vlgmr.msra.gmra.mrb[20].mxu1 %vm66_vm1, %v353_v62 }
  0xfe   :  { %1611 = vmatpush3.bf16.xpose.msra.mxu1 %v698_v63  ;;  %1612 = vmatprep.mubr.msk.bf16.mxu1 %vm1765_vm2, %v1764_v18 }
  0xff   :  { %1622 = vmatprep.subr.bf16.mxu1 %v1764_v18 }
 0x105   :  { %1613 = vmatmul.mubr.msk.bf16.vlgmr.msra.gmra.mrb[24].mxu1 %vm66_vm1, %v355_v1 }
 0x106   :  { %1623 = vmatpush3.bf16.msra.mxu1 %v886_v2  ;;  %1624 = vmatprep.mubr.msk.bf16.mxu1 %vm1765_vm2, %v1764_v18 }
 0x107   :  { %1634 = vmatprep.subr.bf16.mxu1 %v1764_v18 }
 0x1b7   :  { %v504_v7 = vpop.f32.mrb[16].mxu0 }
 0x1b8   :  { %v412_v8 = vpop.f32.mrb[8].mxu1  ;;  %v746_v9 = vsel %vm66_vm1, %v504_v7, -inf  ;;  %v1584_v10 = vpop.f32.mrb[17].mxu0 }
 0x1b9   :  { %747 = vmax.xlane.f32.xlu1 %v746_v9  ;;  %v740_v11 = vsel %vm66_vm1, %v412_v8, -inf  ;;  %v1572_v12 = vpop.f32.mrb[9].mxu1  ;;  %v507_v13 = vpop.f32.mrb[18].mxu0 }
 0x1ba   :  { %741 = vmax.xlane.f32.xlu0 %v740_v11  ;;  %v415_v14 = vpop.f32.mrb[10].mxu1  ;;  %v1585_v15 = vpop.f32.mrb[19].mxu0 }
 0x1bb   :  { %v1573_v16 = vpop.f32.mrb[11].mxu1 }
 0x1c0   :  { %v458_v17 = vpop.f32.mrb[12].mxu1  ;;  %v596_v19 = vpop.f32.mrb[20].mxu0 }
 0x1c1   :  { %v1578_v20 = vpop.f32.mrb[13].mxu1  ;;  %v743_v21 = vsel %vm66_vm1, %v458_v17, -inf  ;;  %v1596_v22 = vpop.f32.mrb[21].mxu0  ;;  %v752_v26 = vsel %vm66_vm1, %v596_v19, -inf }
 0x1c2   :  { %744 = vmax.xlane.f32.xlu0 %v743_v21  ;;  %v461_v23 = vpop.f32.mrb[14].mxu1  ;;  %v599_v24 = vpop.f32.mrb[22].mxu0 }
 0x1c3   :  { %v1579_v25 = vpop.f32.mrb[15].mxu1  ;;  %v1597_v27 = vpop.f32.mrb[23].mxu0 }
 0x1c6   :  { %753 = vmax.xlane.f32.xlu0 %v752_v26 }
 0x1c8   :  { %v550_v28 = vpop.f32.mrb[16].mxu1  ;;  %v688_v29 = vpop.f32.mrb[24].mxu0 }
 0x1c9   :  { %v1590_v30 = vpop.f32.mrb[17].mxu1  ;;  %v749_v31 = vsel %vm66_vm1, %v550_v28, -inf  ;;  %v758_v32 = vsel %vm66_vm1, %v688_v29, -inf  ;;  %v1608_v33 = vpop.f32.mrb[25].mxu0 }
 0x1ca   :  { %v553_v34 = vpop.f32.mrb[18].mxu1  ;;  %750 = vmax.xlane.f32.xlu1 %v749_v31  ;;  %759 = vmax.xlane.f32.xlu0 %v758_v32  ;;  %v691_v35 = vpop.f32.mrb[26].mxu0 }
 0x1cb   :  { %v1591_v36 = vpop.f32.mrb[19].mxu1  ;;  %v1609_v37 = vpop.f32.mrb[27].mxu0  ;;  %v366_v35 = vpack.c.bf16 %v1878_v50, %v1878_v50 }
 0x1d0   :  { %v642_v38 = vpop.f32.mrb[20].mxu1 }
 0x1d1   :  { %v755_v39 = vsel %vm66_vm1, %v642_v38, -inf  ;;  %v1602_v40 = vpop.f32.mrb[21].mxu1 }
 0x1d2   :  { %756 = vmax.xlane.f32.xlu1 %v755_v39  ;;  %v645_v41 = vpop.f32.mrb[22].mxu1  ;;  %v932_v40 = vsel %vm79_vm0, %v366_v35, 0 }
 0x1d3   :  { %v1603_v42 = vpop.f32.mrb[23].mxu1 }
 0x1d8   :  { %v734_v43 = vpop.f32.mrb[24].mxu1 }
 0x1d9   :  { %v1614_v44 = vpop.f32.mrb[25].mxu1  ;;  %v761_v45 = vsel %vm66_vm1, %v734_v43, -inf }
 0x1da   :  { %v737_v46 = vpop.f32.mrb[26].mxu1  ;;  %762 = vmax.xlane.f32.xlu1 %v761_v45  ;;  %v367_v44 = vpack.c.bf16 %v1883_v53, %v1883_v53  ;;  %v368_v45 = vpack.c.bf16 %v1913_v4, %v1913_v4 }
 0x1db   :  { %v1615_v47 = vpop.f32.mrb[27].mxu1 }
 0x246   :  { %v748_v48 = vpop.xlane.xlu1 %747 }
 0x247   :  { %v766_v49 = vsub.f32 %v504_v7, %v748_v48  ;;  %v742_v51 = vpop.xlane.xlu0 %741 }
 0x248   :  { %v764_v52 = vsub.f32 %v412_v8, %v742_v51  ;;  %v978_v51 = vsel %vm79_vm0, %v367_v44, 0 }
 0x249   :  { %v776_v54 = vmul.f32 1.442695, %v766_v49 }
 0x24a   :  { %v772_v55 = vmul.f32 1.442695, %v764_v52  ;;  %v1024_v52 = vsel %vm79_vm0, %v368_v45, 0 }
 0x24c   :  { %1708 = vpow2.f32 %v772_v55  ;;  %v370_v55 = vpack.c.bf16 %v1911_v3, %v1911_v3 }
 0x24d   :  { %1710 = vpow2.f32 %v776_v54 }
 0x24f   :  { %v745_v56 = vpop.xlane.xlu0 %744 }
 0x250   :  { %v765_v57 = vsub.f32 %v458_v17, %v745_v56  ;;  %v369_v56 = vpack.c.bf16 %v1917_v6, %v1917_v6 }
 0x252   :  { %v774_v58 = vmul.f32 1.442695, %v765_v57 }
 0x253   :  { %v754_v59 = vpop.xlane.xlu0 %753 }
 0x254   :  { %1712 = vpow2.f32 %v774_v58  ;;  %v768_v60 = vsub.f32 %v596_v19, %v754_v59 }
 0x256   :  { %v1709_v61 = vpop.eup %1708  ;;  %v780_v62 = vmul.f32 1.442695, %v768_v60 }
 0x257   :  { %v751_v63 = vpop.xlane.xlu1 %750  ;;  %v760_v0 = vpop.xlane.xlu0 %759  ;;  %v788_v1 = vsel %vm66_vm1, %v1709_v61, 0.0 }
 0x258   :  { %v1711_v2 = vpop.eup %1710  ;;  %1714 = vpow2.f32 %v780_v62  ;;  %v767_v7 = vsub.f32 %v550_v28, %v751_v63  ;;  %v770_v8 = vsub.f32 %v688_v29, %v760_v0  ;;  %789 = vadd.xlane.f32.xlu0 %v788_v1  ;;  %v1070_v62 = vsel %vm79_vm0, %v369_v56, 0 }
 0x259   :  { %v794_v11 = vsel %vm66_vm1, %v1711_v2, 0.0  ;;  %v371_v0 = vpack.c.bf16 %v1915_v5, %v1915_v5 }
 0x25a   :  { %v778_v9 = vmul.f32 1.442695, %v767_v7  ;;  %v784_v10 = vmul.f32 1.442695, %v770_v8 }
 0x25b   :  { %v1162_v8 = vsel %vm79_vm0, %v371_v0, 0 }
 0x25c   :  { %1716 = vpow2.f32 %v778_v9  ;;  %795 = vadd.xlane.f32.xlu0 %v794_v11  ;;  %v1205_v11 = vld [vmem:[%s2038_s2] sm:$0xf] }
 0x25d   :  { %1718 = vpow2.f32 %v784_v10 }
 0x25e   :  { %v1713_v12 = vpop.eup %1712 }
 0x25f   :  { %v757_v13 = vpop.xlane.xlu1 %756  ;;  %v791_v14 = vsel %vm66_vm1, %v1713_v12, 0.0 }
 0x260   :  { %v769_v15 = vsub.f32 %v642_v38, %v757_v13  ;;  %792 = vadd.xlane.f32.xlu1 %v791_v14  ;;  %v1475_v13 = vld [vmem:[%s2038_s2 + $0x4] sm:$0xf] }
 0x261   :  { %v1213_v14 = vsel %vm79_vm0, %v1475_v13, 0 }
 0x262   :  { %v1715_v16 = vpop.eup %1714  ;;  %v782_v17 = vmul.f32 1.442695, %v769_v15 }
 0x263   :  { %v800_v19 = vsel %vm66_vm1, %v1715_v16, 0.0 }
 0x264   :  { %1720 = vpow2.f32 %v782_v17  ;;  %801 = vadd.xlane.f32.xlu0 %v800_v19 }
 0x266   :  { %v1717_v20 = vpop.eup %1716 }
 0x267   :  { %v1931_v21 = vpop.eup %1718  ;;  %v763_v22 = vpop.xlane.xlu1 %762  ;;  %v797_v23 = vsel %vm66_vm1, %v1717_v20, 0.0 }
 0x268   :  { %v771_v24 = vsub.f32 %v734_v43, %v763_v22  ;;  %798 = vadd.xlane.f32.xlu1 %v797_v23  ;;  %v806_v25 = vsel %vm66_vm1, %v1931_v21, 0.0 }
 0x269   :  { %807 = vadd.xlane.f32.xlu0 %v806_v25 }
 0x26a   :  { %v786_v26 = vmul.f32 1.442695, %v771_v24 }
 0x26c   :  { %1722 = vpow2.f32 %v786_v26 }
 0x26e   :  { %v1936_v27 = vpop.eup %1720 }
 0x26f   :  { %v803_v28 = vsel %vm66_vm1, %v1936_v27, 0.0 }
 0x270   :  { %804 = vadd.xlane.f32.xlu1 %v803_v28 }
 0x276   :  { %v1940_v29 = vpop.eup %1722 }
 0x277   :  { %v809_v30 = vsel %vm66_vm1, %v1940_v29, 0.0 }
 0x278   :  { %810 = vadd.xlane.f32.xlu1 %v809_v30 }
 0x2e5   :  { %v790_v31 = vpop.xlane.xlu0 %789 }
 0x2e6   :  { %1724 = vrcp.f32 %v790_v31  ;;  %v1478_v31 = vld [vmem:[%s2038_s2 + $0x8] sm:$0xf] }
 0x2e9   :  { %v796_v32 = vpop.xlane.xlu0 %795 }
 0x2ea   :  { %1726 = vrcp.f32 %v796_v32 }
 0x2ed   :  { %v793_v33 = vpop.xlane.xlu1 %792 }
 0x2ee   :  { %1728 = vrcp.f32 %v793_v33 }
 0x2f0   :  { %v1725_v34 = vpop.eup %1724 }
 0x2f1   :  { %v820_v36 = vmul.f32 %v1725_v34, %v1709_v61  ;;  %v802_v37 = vpop.xlane.xlu0 %801  ;;  %v1116_v61 = vsel %vm79_vm0, %v370_v55, 0 }
 0x2f2   :  { %1730 = vrcp.f32 %v802_v37  ;;  %v1310_v37 = vsel %vm79_vm0, %v1478_v31, 0 }
 0x2f3   :  { %v828_v38 = vpack.c.bf16 %v820_v36, %v820_v36 }
 0x2f4   :  { %v1727_v39 = vpop.eup %1726 }
 0x2f5   :  { %v799_v41 = vpop.xlane.xlu1 %798  ;;  %1619 = vmatmul.mubr.msk.bf16.vlgmr.msra.gmra.mrb[28].mxu0 %vm66_vm1, %v828_v38  ;;  %v822_v42 = vmul.f32 %v1727_v39, %v1711_v2 }
 0x2f6   :  { %1732 = vrcp.f32 %v799_v41  ;;  %1629 = vmatpush3.bf16.msra.mxu0 %v932_v40  ;;  %1630 = vmatprep.mubr.msk.bf16.mxu0 %vm1765_vm2, %v1764_v18  ;;  %v808_v43 = vpop.xlane.xlu0 %807 }
 0x2f7   :  { %1640 = vmatprep.subr.bf16.mxu0 %v1764_v18  ;;  %1734 = vrcp.f32 %v808_v43  ;;  %v830_v48 = vpack.c.bf16 %v822_v42, %v822_v42 }
 0x2f8   :  { %v1729_v50 = vpop.eup %1728 }
 0x2f9   :  { %v821_v46 = vmul.f32 %v1729_v50, %v1713_v12  ;;  %v1260_v12 = vsel %vm79_vm0, %v1205_v11, 0 }
 0x2fb   :  { %v829_v47 = vpack.c.bf16 %v821_v46, %v821_v46 }
 0x2fc   :  { %v1731_v49 = vpop.eup %1730 }
 0x2fd   :  { %1625 = vmatmul.mubr.msk.bf16.vlgmr.msra.gmra.mrb[28].mxu1 %vm66_vm1, %v829_v47  ;;  %v805_v54 = vpop.xlane.xlu1 %804  ;;  %1631 = vmatmul.mubr.msk.bf16.vlgmr.msra.gmra.mrb[32].mxu0 %vm66_vm1, %v830_v48  ;;  %v824_v53 = vmul.f32 %v1731_v49, %v1715_v16 }
 0x2fe   :  { %1635 = vmatpush3.bf16.msra.mxu1 %v978_v51  ;;  %1736 = vrcp.f32 %v805_v54  ;;  %1641 = vmatpush3.bf16.msra.mxu0 %v1024_v52 }
 0x2ff   :  { %1636 = vmatprep.mubr.msk.bf16.mxu1 %vm1765_vm2, %v1764_v18  ;;  %1642 = vmatprep.mubr.msk.bf16.mxu0 %vm1765_vm2, %v1764_v18  ;;  %v832_v59 = vpack.c.bf16 %v824_v53, %v824_v53 }
 0x300   :  { %v1733_v4 = vpop.eup %1732  ;;  %1646 = vmatprep.subr.bf16.mxu1 %v1764_v18  ;;  %1652 = vmatprep.subr.bf16.mxu0 %v1764_v18 }
 0x301   :  { %v823_v57 = vmul.f32 %v1733_v4, %v1717_v20  ;;  %v1735_v60 = vpop.eup %1734  ;;  %v1480_v20 = vld [vmem:[%s2038_s2 + $0xc] sm:$0xf] }
 0x302   :  { %v826_v3 = vmul.f32 %v1735_v60, %v1931_v21  ;;  %v1362_v26 = vsel %vm79_vm0, %v1480_v20, 0 }
 0x303   :  { %v831_v58 = vpack.c.bf16 %v823_v57, %v823_v57 }
 0x304   :  { %v834_v2 = vpack.c.bf16 %v826_v3, %v826_v3 }
 0x305   :  { %1637 = vmatmul.mubr.msk.bf16.vlgmr.msra.gmra.mrb[32].mxu1 %vm66_vm1, %v831_v58  ;;  %v811_v63 = vpop.xlane.xlu1 %810  ;;  %1643 = vmatmul.mubr.msk.bf16.vlgmr.msra.gmra.mrb[36].mxu0 %vm66_vm1, %v832_v59 }
 0x306   :  { %1738 = vrcp.f32 %v811_v63  ;;  %1647 = vmatpush3.bf16.msra.mxu1 %v1070_v62  ;;  %1653 = vmatpush3.bf16.msra.mxu0 %v1116_v61 }
 0x307   :  { %1648 = vmatprep.mubr.msk.bf16.mxu1 %vm1765_vm2, %v1764_v18  ;;  %1654 = vmatprep.mubr.msk.bf16.mxu0 %vm1765_vm2, %v1764_v18 }
 0x308   :  { %v1737_v6 = vpop.eup %1736  ;;  %1658 = vmatprep.subr.bf16.mxu1 %v1764_v18  ;;  %1664 = vmatprep.subr.bf16.mxu0 %v1764_v18 }
 0x309   :  { %v825_v1 = vmul.f32 %v1737_v6, %v1936_v27 }
 0x30b   :  { %v833_v7 = vpack.c.bf16 %v825_v1, %v825_v1 }
 0x30d   :  { %1649 = vmatmul.mubr.msk.bf16.vlgmr.msra.gmra.mrb[36].mxu1 %vm66_vm1, %v833_v7  ;;  %1655 = vmatmul.mubr.msk.bf16.vlgmr.msra.gmra.mrb[40].mxu0 %vm66_vm1, %v834_v2 }
 0x30e   :  { %1659 = vmatpush3.bf16.msra.mxu1 %v1162_v8  ;;  %1660 = vmatprep.mubr.msk.bf16.mxu1 %vm1765_vm2, %v1764_v18 }
 0x30f   :  { %1670 = vmatprep.subr.bf16.mxu1 %v1764_v18  ;;  %1666 = vmatprep.mubr.msk.bf16.mxu0 %vm1765_vm2, %v1764_v18 }
 0x310   :  { %v1739_v5 = vpop.eup %1738  ;;  %1665 = vmatpush3.bf16.msra.mxu0 %v1213_v14 }
 0x311   :  { %v827_v9 = vmul.f32 %v1739_v5, %v1940_v29  ;;  %1676 = vmatprep.subr.bf16.mxu0 %v1764_v18  ;;  %v1482_v5 = vld [vmem:[%s2039_s3] ss:$0 sm:$0xff] }
 0x313   :  { %v835_v10 = vpack.c.bf16 %v827_v9, %v827_v9 }
 0x315   :  { %1661 = vmatmul.mubr.msk.bf16.vlgmr.msra.gmra.mrb[40].mxu1 %vm66_vm1, %v835_v10 }
 0x316   :  { %1672 = vmatprep.mubr.msk.bf16.mxu1 %vm1765_vm2, %v1764_v18  ;;  %1671 = vmatpush3.bf16.msra.mxu1 %v1260_v12 }
 0x317   :  { %1682 = vmatprep.subr.bf16.mxu1 %v1764_v18 }
 0x3c8   :  { %v876_v15 = vpop.f32.mrb[28].mxu0 }
 0x3c9   :  { %v1620_v16 = vpop.f32.mrb[29].mxu0 }
 0x3ca   :  { %v879_v17 = vpop.f32.mrb[30].mxu0 }
 0x3cb   :  { %v1621_v19 = vpop.f32.mrb[31].mxu0 }
 0x3d0   :  { %v922_v21 = vpop.f32.mrb[28].mxu1  ;;  %v968_v22 = vpop.f32.mrb[32].mxu0 }
 0x3d1   :  { %v1204_v23 = vpack.c.bf16 %v922_v21, %v876_v15  ;;  %v1626_v24 = vpop.f32.mrb[29].mxu1  ;;  %v1632_v25 = vpop.f32.mrb[33].mxu0 }
 0x3d2   :  { %v925_v27 = vpop.f32.mrb[30].mxu1  ;;  %v971_v28 = vpop.f32.mrb[34].mxu0 }
 0x3d3   :  { %v1627_v29 = vpop.f32.mrb[31].mxu1  ;;  %v1633_v30 = vpop.f32.mrb[35].mxu0  ;;  %1673 = vmatmul.mubr.msk.bf16.vlgmr.msra.gmra.mrb[44].mxu1 %vm66_vm1, %v1204_v23 }
 0x3d4   :  { %1683 = vmatpush3.bf16.msra.mxu1 %v1362_v26  ;;  %1684 = vmatprep.mubr.msk.bf16.mxu1 %vm1765_vm2, %v1764_v18 }
 0x3d8   :  { %v1014_v32 = vpop.f32.mrb[32].mxu1  ;;  %v1060_v33 = vpop.f32.mrb[36].mxu0 }
 0x3d9   :  { %v1206_v34 = vpack.c.bf16 %v1014_v32, %v968_v22  ;;  %v1638_v35 = vpop.f32.mrb[33].mxu1  ;;  %v1644_v36 = vpop.f32.mrb[37].mxu0 }
 0x3da   :  { %v1017_v38 = vpop.f32.mrb[34].mxu1  ;;  %v1063_v39 = vpop.f32.mrb[38].mxu0 }
 0x3db   :  { %v1639_v40 = vpop.f32.mrb[35].mxu1  ;;  %v1645_v41 = vpop.f32.mrb[39].mxu0  ;;  %1667 = vmatmul.mubr.msk.bf16.vlgmr.msra.gmra.mrb[44].mxu0 %vm66_vm1, %v1206_v34 }
 0x3dc   :  { %1677 = vmatpush3.bf16.msra.mxu0 %v1310_v37  ;;  %1678 = vmatprep.mubr.msk.bf16.mxu0 %vm1765_vm2, %v1764_v18 }
 0x3e0   :  { %v1106_v42 = vpop.f32.mrb[36].mxu1  ;;  %v1152_v43 = vpop.f32.mrb[40].mxu0 }
 0x3e1   :  { %v1303_v50 = vpack.c.bf16 %v1106_v42, %v1060_v33  ;;  %v1650_v44 = vpop.f32.mrb[37].mxu1  ;;  %v1656_v45 = vpop.f32.mrb[41].mxu0 }
 0x3e2   :  { %v1109_v46 = vpop.f32.mrb[38].mxu1  ;;  %v1155_v47 = vpop.f32.mrb[42].mxu0 }
 0x3e3   :  { %v1651_v48 = vpop.f32.mrb[39].mxu1  ;;  %v1657_v49 = vpop.f32.mrb[43].mxu0  ;;  %1679 = vmatmul.mubr.msk.bf16.vlgmr.msra.gmra.mrb[48].mxu0 %vm66_vm1, %v1303_v50 }
 0x3e8   :  { %v1198_v51 = vpop.f32.mrb[40].mxu1 }
 0x3e9   :  { %v1355_v52 = vpack.c.bf16 %v1198_v51, %v1152_v43  ;;  %v1662_v54 = vpop.f32.mrb[41].mxu1 }
 0x3ea   :  { %v1201_v53 = vpop.f32.mrb[42].mxu1 }
 0x3eb   :  { %v1663_v4 = vpop.f32.mrb[43].mxu1  ;;  %1685 = vmatmul.mubr.msk.bf16.vlgmr.msra.gmra.mrb[48].mxu1 %vm66_vm1, %v1355_v52 }
 0x4a6   :  { %v1296_v55 = vpop.f32.mrb[44].mxu1 }
 0x4a7   :  { %v1674_v18 = vpop.f32.mrb[45].mxu1 }
 0x4a8   :  { %v1299_v56 = vpop.f32.mrb[46].mxu1 }
 0x4a9   :  { %v1675_v57 = vpop.f32.mrb[47].mxu1 }
 0x4ae   :  { %v1249_v58 = vpop.f32.mrb[44].mxu0 }
 0x4af   :  { %v1297_v59 = vadd.f32 %v1296_v55, %v1249_v58  ;;  %v1668_v60 = vpop.f32.mrb[45].mxu0 }
 0x4b0   :  { %v1252_v61 = vpop.f32.mrb[46].mxu0 }
 0x4b1   :  { %v1300_v62 = vadd.f32 %v1299_v56, %v1252_v61  ;;  %v1669_v63 = vpop.f32.mrb[47].mxu0 }
 0x4b6   :  { %v1346_v3 = vpop.f32.mrb[48].mxu0 }
 0x4b7   :  { %v1353_v6 = vadd.f32 %v1346_v3, %v1297_v59  ;;  %v1680_v0 = vpop.f32.mrb[49].mxu0 }
 0x4b8   :  { %v1349_v1 = vpop.f32.mrb[50].mxu0 }
 0x4b9   :  { %v1354_v2 = vadd.f32 %v1349_v1, %v1300_v62  ;;  %v1681_v7 = vpop.f32.mrb[51].mxu0 }
 0x4be   :  { %v1398_v8 = vpop.f32.mrb[48].mxu1 }
 0x4bf   :  { %v1405_v9 = vadd.f32 %v1398_v8, %v1353_v6  ;;  %v1686_v10 = vpop.f32.mrb[49].mxu1 }
 0x4c0   :  { %v1401_v11 = vpop.f32.mrb[50].mxu1 }
 0x4c1   :  { %v1414_v12 = vadd.f32 %v1482_v5, %v1405_v9  ;;  %v1406_v13 = vadd.f32 %v1401_v11, %v1354_v2  ;;  %v1687_v14 = vpop.f32.mrb[51].mxu1 }
 0x4c3   :  { %1417 = vst.msk [vmem:[#allocation2] sm:$0xff] %vm1416_vm3, %v1414_v12  ;;  %v1415_v15 = vadd.f32 %v1482_v5, %v1406_v13 }
 0x4c5   :  { %1418 = vst.msk [vmem:[#allocation2 + $0x8] sm:$0xff] %vm1416_vm3, %v1415_v15 }
 0x4c6   :  { %1751 = shalt.err (!%p1748_p4)
}
 0x4c7   :  { %s1752_s30 = scalar_lea.hbm %s2040_s4, 256 }
 0x4c8   :  { %p1753_p5 = scmp.ne.s32.totalorder %s2040_s4, %s1752_s30  ;;  %p1756_p6 = scmp.lt.u32.totalorder %s1752_s30, %s2040_s4 }
 0x4ca   :  { %p1758_p7 = pnand %p1756_p6, %p1753_p5 }
 0x4cc   :  { %1761 = shalt.err (!%p1758_p7)
}
 0x4cd   :  { %s1767_s9 = smov 128   ;;  %s1768_s10 = smov 8  }
 0x4ce   :  { %1430 = dma.vmem_to_hbm [thread:$0]  %s1425_s27, 256, %s2040_s4, [#allocation3], %s1767_s9, %s1767_s9, %s1768_s10  }
 0x4cf   :  { %1762 = dma.done.wait [#allocation3], 256  }
 0x4d0   :  { %1763 = vsyncadd [#allocation3], 4294967040 }
 0x4d1   :  { %1434 = vsyncpa [#allocation3], 1 }

</bundles_post_ra>
